<compile_context>
chip_gen: v6e
topology: v6e:2x2x1
jax: 0.10.0
libtpu: 0.0.40
codegen_flags: <defaults>
</compile_context>

<pallas_src>
import functools

import jax
import jax.numpy as jnp
from jax.experimental import pallas as pl
from jax.experimental.pallas import tpu as pltpu

_EPS = 1e-6  # matches torch F.pairwise_distance default eps


def _round_up(x, m):
    return ((x + m - 1) // m) * m


def _contrastive_loss_kernel(o1_ref, o2_ref, label_ref, out_ref, acc_ref, *,
                             margin, n_rows, block_rows, tiles_per_slice,
                             needs_mask):
    i = pl.program_id(1)  # reduction step within this slice

    @pl.when(i == 0)
    def _init():
        acc_ref[...] = jnp.zeros_like(acc_ref)

    o1 = o1_ref[...].astype(jnp.float32)          # (TN, D)
    o2 = o2_ref[...].astype(jnp.float32)          # (TN, D)
    label = label_ref[...].astype(jnp.float32)    # (TN, 1)

    diff = o1 - o2 + _EPS                                       # eps on the difference (torch)
    dist_sq = jnp.sum(diff * diff, axis=-1, keepdims=True)      # (TN, 1)
    dist = jnp.sqrt(dist_sq)                                    # euclidean_distance (EUP)
    hinge = jnp.maximum(margin - dist, 0.0)                     # clamp(margin - d, min=0)
    per_row = (1.0 - label) * dist_sq + label * (hinge * hinge)  # (TN, 1)

    if needs_mask:
        c = pl.program_id(0)
        row_start = (c * tiles_per_slice + i) * block_rows
        rows = jax.lax.broadcasted_iota(jnp.int32, (block_rows, 1), 0) + row_start
        per_row = jnp.where(rows < n_rows, per_row, 0.0)

    acc_ref[...] += per_row

    @pl.when(i == tiles_per_slice - 1)
    def _finalize():
        total = jnp.sum(acc_ref[...])                           # slice partial sum (scalar)
        out_ref[...] = jnp.full(out_ref.shape, total, dtype=out_ref.dtype)


def contrastive_loss(output1, output2, label, *, margin=2.0, block_rows=None):
    n, d = output1.shape
    itemsize = jnp.dtype(output1.dtype).itemsize

    # Row tile: multiple of the sublane pack (8 for f32, 16 for bf16, ...),
    # big enough to amortize per-step overhead, small enough that
    # 2 inputs x 2 pipeline buffers stay well within scoped VMEM.
    row_align = max(8, 32 // itemsize)
    if block_rows is None:
        vmem_cap_rows = max(row_align,
                            ((4 << 20) // max(1, d * itemsize)) // row_align * row_align)
        block_rows = max(row_align, min(1024, _round_up(n, row_align), vmem_cap_rows))
    else:
        block_rows = max(row_align, _round_up(int(block_rows), row_align))

    tile_count = -(-n // block_rows)
    # Split the reduction across two TensorCores (v7x) only when it divides
    # evenly, so no grid step ever points at a fully out-of-bounds block.
    num_slices = 2 if (tile_count >= 2 and tile_count % 2 == 0) else 1
    tiles_per_slice = tile_count // num_slices
    needs_mask = (n % block_rows) != 0

    label2d = label.reshape(n, 1).astype(jnp.float32)

    tile_bytes = block_rows * d * itemsize
    vmem_est = 2 * (2 * tile_bytes + block_rows * 4) + block_rows * 4 + (2 << 20)
    vmem_limit = int(min(max(vmem_est, 16 << 20), 120 << 20))

    kernel = functools.partial(
        _contrastive_loss_kernel,
        margin=float(margin),
        n_rows=n,
        block_rows=block_rows,
        tiles_per_slice=tiles_per_slice,
        needs_mask=needs_mask,
    )

    def in_map(c, i):
        return (c * tiles_per_slice + i, 0)

    partials = pl.pallas_call(
        kernel,
        out_shape=jax.ShapeDtypeStruct((num_slices, 8, 128), jnp.float32),
        grid_spec=pltpu.PrefetchScalarGridSpec(
            num_scalar_prefetch=0,
            grid=(num_slices, tiles_per_slice),
            in_specs=[
                pl.BlockSpec((block_rows, d), in_map),
                pl.BlockSpec((block_rows, d), in_map),
                pl.BlockSpec((block_rows, 1), in_map),
            ],
            out_specs=pl.BlockSpec((1, 8, 128), lambda c, i: (c, 0, 0)),
            scratch_shapes=[pltpu.VMEM((block_rows, 1), jnp.float32)],
        ),
        compiler_params=pltpu.CompilerParams(
            dimension_semantics=("parallel", "arbitrary"),
            vmem_limit_bytes=vmem_limit,
        ),
    )(output1, output2, label2d)

    # Combine per-core partial sums outside the kernel (no cross-core race),
    # single divide by N for the mean.
    return jnp.sum(partials[:, 0, 0]) * (1.0 / n)


def _reference(output1, output2, label, margin=2.0):
    diff = output1.astype(jnp.float32) - output2.astype(jnp.float32) + _EPS
    dist = jnp.sqrt(jnp.sum(diff * diff, axis=-1))
    loss = (1.0 - label) * dist**2 + label * jnp.maximum(margin - dist, 0.0) ** 2
    return jnp.mean(loss)


if __name__ == "__main__":
    key = jax.random.PRNGKey(0)
    k1, k2, k3 = jax.random.split(key, 3)

    # Small shapes; N=44 with block_rows=8 exercises the multi-tile reduction,
    # the 2-way slice split, and the tail-row masking path.
    N, D = 44, 32
    output1 = jax.random.normal(k1, (N, D), dtype=jnp.float32)
    output2 = jax.random.normal(k2, (N, D), dtype=jnp.float32)
    # binary similarity labels (0 = similar pair, 1 = dissimilar pair)
    label = jax.random.bernoulli(k3, 0.5, (N,)).astype(jnp.float32)

    loss = contrastive_loss(output1, output2, label, block_rows=8)
    loss = jax.block_until_ready(loss)

    ref = _reference(output1, output2, label)
    assert jnp.allclose(loss, ref, rtol=1e-5, atol=1e-5), (loss, ref)

    print("KERNEL_OK")
</pallas_src>

<mosaic_0001>
module attributes {stable_mosaic.version = 11 : i64} {
  func.func @_contrastive_loss_kernel(%arg0: i32, %arg1: i32, %arg2: memref<8x32xf32, #tpu.memory_space<vmem>>, %arg3: memref<8x32xf32, #tpu.memory_space<vmem>>, %arg4: memref<8x1xf32, #tpu.memory_space<vmem>>, %arg5: memref<1x8x128xf32, #tpu.memory_space<vmem>>, %arg6: memref<8x1xf32, #tpu.memory_space<vmem>>) attributes {dimension_semantics = [#tpu.dimension_semantics<parallel>, #tpu.dimension_semantics<arbitrary>], iteration_bounds = array<i64: 2, 3>, scalar_prefetch = 0 : i64, scratch_operands = 1 : i64, tpu.core_type = #tpu.core_type<tc>, window_params = [{transform_indices = @transform_0, window_bounds = array<i64: 8, 32>}, {transform_indices = @transform_1, window_bounds = array<i64: 8, 32>}, {transform_indices = @transform_2, window_bounds = array<i64: 8, 1>}, {transform_indices = @transform_3, window_bounds = array<i64: 1, 8, 128>}]} {
    %c0_i32 = arith.constant 0 : i32
    %0 = arith.cmpi eq, %arg1, %c0_i32 : i32
    %1 = arith.extui %0 : i1 to i32
    %c0_i32_0 = arith.constant 0 : i32
    %2 = arith.cmpi ne, %1, %c0_i32_0 : i32
    scf.if %2 {
      %cst_16 = arith.constant 0.000000e+00 : f32
      %39 = vector.broadcast %cst_16 : f32 to vector<8x1xf32>
      %c0_17 = arith.constant 0 : index
      %c0_18 = arith.constant 0 : index
      %40 = vector.load %arg6[%c0_17, %c0_18] : memref<8x1xf32, #tpu.memory_space<vmem>>, vector<8x1xf32>
      tpu.vector_store %arg6[%c0_17, %c0_18], %39 {strides = array<i32>} : memref<8x1xf32, #tpu.memory_space<vmem>>, vector<8x1xf32>,
    } else {
    }
    %c0 = arith.constant 0 : index
    %c0_1 = arith.constant 0 : index
    %3 = vector.load %arg2[%c0, %c0_1] : memref<8x32xf32, #tpu.memory_space<vmem>>, vector<8x32xf32>
    %c0_2 = arith.constant 0 : index
    %c0_3 = arith.constant 0 : index
    %4 = vector.load %arg3[%c0_2, %c0_3] : memref<8x32xf32, #tpu.memory_space<vmem>>, vector<8x32xf32>
    %c0_4 = arith.constant 0 : index
    %c0_5 = arith.constant 0 : index
    %5 = vector.load %arg4[%c0_4, %c0_5] : memref<8x1xf32, #tpu.memory_space<vmem>>, vector<8x1xf32>
    %6 = arith.subf %3, %4 : vector<8x32xf32>
    %cst = arith.constant 9.99999997E-7 : f32
    %7 = vector.broadcast %cst : f32 to vector<8x32xf32>
    %8 = arith.addf %6, %7 : vector<8x32xf32>
    %9 = arith.mulf %8, %8 : vector<8x32xf32>
    %cst_6 = arith.constant dense<0.000000e+00> : vector<8xf32>
    %10 = vector.multi_reduction <add>, %9, %cst_6 [1] : vector<8x32xf32> to vector<8xf32>
    %11 = vector.shape_cast %10 : vector<8xf32> to vector<8x1xf32>
    %12 = math.sqrt %11 : vector<8x1xf32>
    %cst_7 = arith.constant 2.000000e+00 : f32
    %13 = vector.broadcast %cst_7 : f32 to vector<8x1xf32>
    %14 = arith.subf %13, %12 : vector<8x1xf32>
    %cst_8 = arith.constant 0.000000e+00 : f32
    %15 = vector.broadcast %cst_8 : f32 to vector<8x1xf32>
    %16 = arith.maximumf %14, %15 : vector<8x1xf32>
    %cst_9 = arith.constant 1.000000e+00 : f32
    %17 = vector.broadcast %cst_9 : f32 to vector<8x1xf32>
    %18 = arith.subf %17, %5 : vector<8x1xf32>
    %19 = arith.mulf %18, %11 : vector<8x1xf32>
    %20 = arith.mulf %16, %16 : vector<8x1xf32>
    %21 = arith.mulf %5, %20 : vector<8x1xf32>
    %22 = arith.addf %19, %21 : vector<8x1xf32>
    %c3_i32 = arith.constant 3 : i32
    %23 = arith.muli %arg0, %c3_i32 : i32
    %24 = arith.addi %23, %arg1 : i32
    %c8_i32 = arith.constant 8 : i32
    %25 = arith.muli %24, %c8_i32 : i32
    %26 = tpu.iota {dimensions = array<i32: 0>} : vector<8x1xi32>
    %27 = vector.broadcast %25 : i32 to vector<8x1xi32>
    %28 = arith.addi %26, %27 : vector<8x1xi32>
    %c44_i32 = arith.constant 44 : i32
    %29 = vector.broadcast %c44_i32 : i32 to vector<8x1xi32>
    %30 = arith.cmpi slt, %28, %29 : vector<8x1xi32>
    %cst_10 = arith.constant 0.000000e+00 : f32
    %31 = vector.broadcast %cst_10 : f32 to vector<8x1xf32>
    %32 = arith.select %30, %22, %31 : vector<8x1xi1>, vector<8x1xf32>
    %c0_11 = arith.constant 0 : index
    %c0_12 = arith.constant 0 : index
    %33 = vector.load %arg6[%c0_11, %c0_12] : memref<8x1xf32, #tpu.memory_space<vmem>>, vector<8x1xf32>
    %34 = arith.addf %33, %32 : vector<8x1xf32>
    %c0_13 = arith.constant 0 : index
    %c0_14 = arith.constant 0 : index
    %35 = vector.load %arg6[%c0_13, %c0_14] : memref<8x1xf32, #tpu.memory_space<vmem>>, vector<8x1xf32>
    tpu.vector_store %arg6[%c0_13, %c0_14], %34 {strides = array<i32>} : memref<8x1xf32, #tpu.memory_space<vmem>>, vector<8x1xf32>,
    %c2_i32 = arith.constant 2 : i32
    %36 = arith.cmpi eq, %arg1, %c2_i32 : i32
    %37 = arith.extui %36 : i1 to i32
    %c0_i32_15 = arith.constant 0 : i32
    %38 = arith.cmpi ne, %37, %c0_i32_15 : i32
    scf.if %38 {
      %c0_16 = arith.constant 0 : index
      %c0_17 = arith.constant 0 : index
      %39 = vector.load %arg6[%c0_16, %c0_17] : memref<8x1xf32, #tpu.memory_space<vmem>>, vector<8x1xf32>
      %40 = vector.shape_cast %39 : vector<8x1xf32> to vector<1x8x1xf32>
      %cst_18 = arith.constant dense<0.000000e+00> : vector<1xf32>
      %41 = vector.multi_reduction <add>, %40, %cst_18 [1, 2] : vector<1x8x1xf32> to vector<1xf32>
      %42 = vector.shape_cast %41 : vector<1xf32> to vector<1x1x1xf32>
      %43 = vector.extract %42[0, 0, 0] : f32 from vector<1x1x1xf32>
      %44 = vector.broadcast %43 : f32 to vector<1x8x128xf32>
      %c0_19 = arith.constant 0 : index
      %c0_20 = arith.constant 0 : index
      %c0_21 = arith.constant 0 : index
      %45 = vector.load %arg5[%c0_19, %c0_20, %c0_21] : memref<1x8x128xf32, #tpu.memory_space<vmem>>, vector<1x8x128xf32>
      tpu.vector_store %arg5[%c0_19, %c0_20, %c0_21], %44 {strides = array<i32>} : memref<1x8x128xf32, #tpu.memory_space<vmem>>, vector<1x8x128xf32>,
    } else {
    }
    return
  }
  func.func @transform_0(%arg0: i32, %arg1: i32) -> (i32, i32) {
    %c3_i32 = arith.constant 3 : i32
    %0 = arith.muli %arg0, %c3_i32 : i32
    %1 = arith.addi %0, %arg1 : i32
    %c0_i32 = arith.constant 0 : i32
    %c0_i32_0 = arith.constant 0 : i32
    return %1, %c0_i32 : i32, i32
  }
  func.func @transform_1(%arg0: i32, %arg1: i32) -> (i32, i32) {
    %c3_i32 = arith.constant 3 : i32
    %0 = arith.muli %arg0, %c3_i32 : i32
    %1 = arith.addi %0, %arg1 : i32
    %c0_i32 = arith.constant 0 : i32
    %c0_i32_0 = arith.constant 0 : i32
    return %1, %c0_i32 : i32, i32
  }
  func.func @transform_2(%arg0: i32, %arg1: i32) -> (i32, i32) {
    %c3_i32 = arith.constant 3 : i32
    %0 = arith.muli %arg0, %c3_i32 : i32
    %1 = arith.addi %0, %arg1 : i32
    %c0_i32 = arith.constant 0 : i32
    %c0_i32_0 = arith.constant 0 : i32
    return %1, %c0_i32 : i32, i32
  }
  func.func @transform_3(%arg0: i32, %arg1: i32) -> (i32, i32, i32) {
    %c0_i32 = arith.constant 0 : i32
    %c0_i32_0 = arith.constant 0 : i32
    %c0_i32_1 = arith.constant 0 : i32
    return %arg0, %c0_i32, %c0_i32_0 : i32, i32, i32
  }
}

</mosaic_0001>

<bundles_post_ra>
// kernel: tpu_custom_call.1
= control target key start
LH: loop header
LB: loop body
LE: loop exit
PB: predicated region body
PF: predicated region fallthrough
CT: control target
= control target key end

     0   :  { %8 = vsyncpa [#allocation4], 0  ;;  %s778_s0 = inlined_call_operand.vmem [shape: f32[44,32], index: 0, kind: input, shape index: {}]   ;;  %s779_s1 = inlined_call_operand.vmem [shape: f32[44,32], index: 1, kind: input, shape index: {}]   ;;  %s780_s2 = inlined_call_operand.vmem [shape: f32[44,1], index: 2, kind: input, shape index: {}]   ;;  %s781_s3 = inlined_call_operand.hbm [shape: f32[2,8,128], index: 3, kind: output, shape index: {}]  }
   0x1   :  { %10 = vsyncpa [#allocation4 + $0x1], 0  ;;  %s630_s12 = smov 0   ;;  %s632_s13 = smov 0  }
   0x2   :  { %s634_s14 = smov 0   ;;  %s636_s15 = smov 0  }
   0x3   :  { %s638_s16 = smov 0   ;;  %s640_s17 = smov 0  }
   0x4   :  { %s642_s18 = smov 0   ;;  %s644_s19 = smov 0  }
   0x5 LB: > { %s422_s20 = sadd.s32 4294967295, %s606_s19   ;;  %s423_s21 = sadd.s32 4294967294, %s606_s19   ;;  %s606_s19 = sphi %s644_s19, %s16_s19   ;;  %s602_s18 = sphi %s642_s18, %s792_s18   ;;  %s598_s17 = sphi %s640_s17, %s791_s17   ;;  %s594_s16 = sphi %s638_s16, %s790_s16   ;;  %s590_s15 = sphi %s636_s15, %s789_s15   ;;  %s586_s14 = sphi %s634_s14, %s788_s14   ;;  %s582_s13 = sphi %s632_s13, %s787_s13   ;;  %s578_s12 = sphi %s630_s12, %s786_s12  }
   0x6   : > { %s25_s22 = sadd.s32 1, %s598_s17  ;;  %s28_s23 = sadd.s32 1, %s602_s18 }
   0x7   : > { %p26_p0 = scmp.ge.s32.totalorder %s25_s22, 3  ;;  %p135_p1 = scmp.ne.s32.totalorder %s586_s14, %s582_s13 }
   0x8   : > { %p136_p2 = scmp.eq.s32.totalorder %s422_s20, 5  ;;  %p141_p4 = scmp.ne.s32.totalorder %s582_s13, %s578_s12 }
   0x9   : > { %s794_s22 = smov (%p26_p0, %s25_s22), 0  ;;  %s796_s23 = smov (!%p26_p0, %s28_s23), %s602_s18 }
   0xa   : > { %p679_p3 = por %p136_p2, %p135_p1  ;;  %p30_p5 = scmp.ge.s32.totalorder %s796_s23, 2 }
   0xb   : > { %p142_p6 = scmp.eq.s32.totalorder %s423_s21, 5  ;;  %p426_p7 = scmp.ge.s32.totalorder %s606_s19, 1 }
   0xc   : > { %p193_p8 = scmp.lt.s32.totalorder %s606_s19, 7  ;;  %s798_s23 = smov (%p30_p5, %s796_s23), 0 }
   0xd   : > { %p689_p9 = por %p142_p6, %p141_p4  ;;  %s122_s26 = ssub.s32 %s602_s18, %s798_s23 }
   0xe   : > { %p194_p10 = pnand %p426_p7, %p193_p8  ;;  %s125_s27 = sadd.s32 1, %s586_s14 }
   0xf   : > { %p123_p11 = scmp.eq.s32.totalorder %s122_s26, 0  ;;  %s782_s29 = sand.u32 (!%p194_p10), 1, %s582_s13  }
  0x10   : > { %197 = sbr.rel (%p194_p10) target bundleno = 444 (0x1bc), region = 32  ;;  %s703_s4 = sshll.u32 (!%p194_p10), %s782_s29, 3 }
  0x11   : > { %s697_s28 = scalar_select %p123_p11, %s586_s14, %s125_s27  }
  0x12   : > { %s230_s30 = smul.u32 (!%p194_p10), 3, %s594_s16  ;;  %s229_s29 = scalar_lea.vmem (!%p194_p10), [#allocation3], %s703_s4 }
  0x13   : > { %p431_p13 = scmp.ne.s32.totalorder (!%p194_p10), %s590_s15, 0 }
  0x14   : > { %s706_s5 = sadd.s32 (!%p194_p10), %s590_s15, %s230_s30 }
  0x15   : > { %p232_p12 = scmp.lt.s32.totalorder %s706_s5, 5 }
  0x17   : > { %s233_s6 = scalar_select %p232_p12, %s706_s5, 5 }
  0x18   : > { %257 = sbr.rel (%p431_p13) target bundleno = 31 (0x1f), region = 36 }
  0x19   : > { %s710_s7 = sshll.u32 %s233_s6, 3 }
  0x1a   : > { %s235_s10 = scalar_lea.vmem %s778_s0, %s710_s7  ;;  %s243_s21 = scalar_lea.vmem %s779_s1, %s710_s7 }
  0x1b   : > { %s251_s30 = scalar_lea.vmem %s780_s2, %s710_s7 }
  0x1d   : > { %vm258_vm0 = vcmask 7168   ;;  %v608_v0 = vmov 0.0  }
  0x1e   : > { %259 = vst.msk [vmem:[#allocation2] sm:$0xff] %vm258_vm0, %v608_v0 }
  0x1f PF: > { %v260_v1 = vld [vmem:[%s235_s10] sm:$0xff]  ;;  %vm266_vm1 = vcmask 261120   ;;  %v287_v9 = vlaneseq  ;;  %s432_s6 = sshll.u32 %s706_s5, 3  ;;  %vm295_vm5 = vcmask 7168   ;;  %p433_p0 = scmp.ne.s32.totalorder %s590_s15, 2 }
  0x20   : > { %v261_v2 = vld [vmem:[%s243_s21] sm:$0xff]  ;;  %v289_v17 = vstv %s432_s6 }
  0x21   : > { %v263_v3 = vsub.f32 %v260_v1, %v261_v2  ;;  %v262_v13 = vld [vmem:[%s251_s30] sm:$0xff]  ;;  %v288_v15 = vshrl.u32 %v287_v9, 7 }
  0x22   : > { %v279_v19 = vsub.f32 1.0, %v262_v13 }
  0x23   : > { %v264_v4 = vadd.f32 1e-06, %v263_v3  ;;  %v290_v20 = vadd.s32 %v289_v17, %v288_v15 }
  0x25   : > { %v265_v5 = vmul.f32 %v264_v4, %v264_v4  ;;  %vm291_vm4 = vcmp.lt.s32.totalorder %v290_v20, 44  ;;  %v293_v25 = vld [vmem:[#allocation2] sm:$0xff] }
  0x27   : > { %v267_v6 = vsel %vm266_vm1, %v265_v5, 0.0 }
  0x28   : > { %268 = vadd.xlane.f32.xlu0 %v267_v6 }
  0xb1   : > { %v269_v7 = vpop.xlane.xlu0 %268 }
  0xb2   : > { %512 = vrsqrt.f32 %v269_v7  ;;  %vm272_vm2 = vcmp.eq.f32.partialorder %v269_v7, inf  ;;  %v275_v11 = vand.u32 2147483648, %v269_v7  ;;  %vm274_vm3 = vcmp.eq.f32.partialorder %v269_v7, 0.0 }
  0xb3   : > { %v280_v22 = vmul.f32 %v279_v19, %v269_v7 }
  0xbf   : > { %v513_v8 = vpop.eup %512 }
  0xc0   : > { %v271_v10 = vmul.f32 %v513_v8, %v269_v7 }
  0xc2   : > { %v273_v12 = vsel %vm272_vm2, %v269_v7, %v271_v10 }
  0xc3   : > { %v276_v14 = vsel %vm274_vm3, %v275_v11, %v273_v12 }
  0xc4   : > { %v277_v16 = vsub.f32 2.0, %v276_v14 }
  0xc6   : > { %v278_v18 = vmax.f32 %v277_v16, 0.0 }
  0xc8   : > { %v281_v21 = vmul.f32 %v278_v18, %v278_v18 }
  0xca   : > { %v282_v23 = vmul.f32 %v281_v21, %v262_v13 }
  0xcc   : > { %v283_v24 = vadd.f32 %v282_v23, %v280_v22 }
  0xcd   : > { %300 = sbr.rel (%p433_p0) target bundleno = 420 (0x1a4), region = 40 }
  0xce   : > { %v292_v26 = vsel %vm291_vm4, %v283_v24, 0.0 }
  0xcf   : > { %v294_v27 = vadd.f32 %v293_v25, %v292_v26 }
  0xd1   : > { %296 = vst.msk [vmem:[#allocation2] sm:$0xff] %vm295_vm5, %v294_v27 }
  0xd8   : > { %v301_v28 = vld [vmem:[#allocation2] sm:$0xff] }
  0xd9   : > { %v302_v29 = vsel %vm295_vm5, %v301_v28, 0.0 }
  0xda   : > { %303 = vadd.xlane.f32.xlu0 %v302_v29 }
 0x163   : > { %v304_v30 = vpop.xlane.xlu0 %303 }
 0x164   : > { %v305_v31 = vrot.slane %v304_v30, 4 }
 0x166   : > { %v306_v32 = vadd.f32 %v305_v31, %v304_v30 }
 0x168   : > { %v307_v33 = vrot.slane %v306_v32, 2 }
 0x16a   : > { %v308_v34 = vadd.f32 %v307_v33, %v306_v32 }
 0x16c   : > { %v309_v35 = vrot.slane %v308_v34, 1 }
 0x16e   : > { %v310_v36 = vadd.f32 %v309_v35, %v308_v34 }
 0x170   : > { %438 = vpush %v310_v36 }
 0x1a1   : > { %s439_s5 = spop %438 }
 0x1a2   : > { %v312_v37 = vstv %s439_s5 }
 0x1a3   : > { %313 = vst [vmem:[%s229_s29] sm:$0xff] %v312_v37 }
 0x1a4 PF: > { %s435_s15 = sshll.u32 %s594_s16, 7  ;;  %s328_s10 = sshll.u32 %s229_s29, 4  ;;  %s329_s10 = int_to_ptr.vmem [resolvable:$true] %s328_s10 }
 0x1a5   : > { %s326_s9 = scalar_lea.hbm %s781_s3, %s435_s15  ;;  %s785_s11 = sand.u32 1, %s582_s13  }
 0x1a6   : > { %s315_s20 = scalar_lea.sflag [#allocation4], %s785_s11  ;;  %s514_s21 = scalar_lea.vmem %s329_s10, 128 }
 0x1a7   : > { %p515_p1 = scmp.ne.s32.totalorder %s329_s10, %s514_s21  ;;  %s609_s26 = smov [#allocation3]  }
 0x1a8   : > { %s518_s27 = sshll.u32 %s609_s26, 4  ;;  %s519_s27 = int_to_ptr.vmem [resolvable:$false] %s518_s27 }
 0x1a9   : > { %p516_p2 = pnand %p515_p1, %p679_p3  ;;  %s520_s30 = scalar_lea.vmem %s519_s27, 256 }
 0x1aa   : > { %p521_p5 = scmp.lt.s32.totalorder %s329_s10, %s519_s27  ;;  %p522_p6 = scmp.lt.s32.totalorder %s520_s30, %s514_s21 }
 0x1ab   : > { %p517_p4 = pneg %p516_p2 }
 0x1ac   : > { %p523_p7 = por %p522_p6, %p521_p5 }
 0x1ae   : > { %p524_p8 = pnand %p523_p7, %p517_p4 }
 0x1b0   : > { %527 = shalt.err (!%p524_p8)
}
 0x1b1   : > { %s528_s16 = scalar_lea.hbm %s326_s9, 128  ;;  %s532_s6 = scalar_lea.hbm %s781_s3, 256 }
 0x1b2   : > { %p529_p10 = scmp.ne.s32.totalorder %s326_s9, %s528_s16  ;;  %p533_p13 = scmp.lt.s32.totalorder %s326_s9, %s781_s3 }
 0x1b3   : > { %p534_p0 = scmp.lt.s32.totalorder %s532_s6, %s528_s16 }
 0x1b4   : > { %p530_p11 = pnand %p529_p10, %p679_p3 }
 0x1b5   : > { %p535_p1 = por %p534_p0, %p533_p13 }
 0x1b6   : > { %p531_p12 = pneg %p530_p11 }
 0x1b8   : > { %p536_p2 = pnand %p535_p1, %p531_p12 }
 0x1ba   : > { %539 = shalt.err (!%p536_p2)
}
 0x1bb   : > { %440 = dma.vmem_to_hbm [thread:$0]  (%p679_p3), %s329_s10, 128, %s326_s9, %s315_s20  }
 0x1bc PF: > { %p446_p4 = scmp.ge.s32.totalorder %s606_s19, 2  ;;  %s340_s7 = sand.u32 1, %s578_s12  }
 0x1bd   : > { %s341_s8 = scalar_lea.sflag [#allocation4], %s340_s7 }
 0x1be   : > { %p443_p5 = pnand %p446_p4, %p689_p9 }
 0x1c0   : > { %p444_p6 = pneg %p443_p5 }
 0x1c2   : > { %573 = dma.done.wait (%p444_p6), %s341_s8, 128  }
 0x1c3   : > { %575 = vsyncadd (%p444_p6), %s341_s8, 4294967168  ;;  %s16_s19 = sadd.s32 1, %s606_s19   ;;  %s786_s12 = smov %s582_s13 }
 0x1c4   : > { %p13_p7 = scmp.ge.s32.totalorder %s16_s19, 8   ;;  %s787_s13 = smov %s586_s14 }
 0x1c5   : > { %s788_s14 = smov %s697_s28  ;;  %s789_s15 = smov %s598_s17 }
 0x1c6   : > { %s790_s16 = smov %s602_s18  ;;  %s791_s17 = smov %s794_s22 }
 0x1c7   : > { %s792_s18 = smov %s798_s23  ;;  %15 = sbr.rel (!%p13_p7) target bundleno = 5 (0x5), region = 81 }
 0x1cc   :  { %346 = vsyncpa [#allocation4], 1 }
 0x1cd   :  { %348 = vsyncpa [#allocation4 + $0x1], 1 }

</bundles_post_ra>
